<compile_context>
chip_gen: v7x
topology: tpu7x:2x2x1
jax: 0.10.0
libtpu: 0.0.40
codegen_flags: <defaults>
</compile_context>

<pallas_src>
import jax
import jax.numpy as jnp
from jax.experimental import pallas as pl
from jax.experimental.pallas import tpu as pltpu

F_HID = 32        # real hidden width (also used to pad the 3-wide input features)
F_LAST_PAD = 128  # lane padding of the final 1-wide output (unmasked vst)


# ------------------------- generation-aware VMEM budget ------------------------------

def _vmem_capacity_bytes():
    try:
        info = pltpu.get_tpu_info()
        cap = int(getattr(info, "vmem_capacity_bytes", 0) or 0)
        if cap > 0:
            return cap
    except Exception:
        pass
    return 64 << 20   # conservative default: v7x per-TensorCore VMEM


def vmem_budget_bytes():
    """~48 MiB on v7x (64 MiB VMEM), ~96 MiB on v5e/v6e (128 MiB VMEM)."""
    cap = _vmem_capacity_bytes()
    budget = min(cap - (16 << 20), (cap * 3) // 4)
    return int(max(16 << 20, min(budget, 112 << 20)))


# ----------------------- fused A-resident kernel (small / medium N) ------------------

def _gcn_net_fused_kernel(a_ref, x_ref,
                          w1_ref, b1_ref,
                          w2_ref, b2_ref,
                          w21_ref, b21_ref,
                          w3_ref, b3_ref,
                          out_ref):
    """All four GCNConv layers fused; A_hat stays resident in VMEM across layers."""
    a = a_ref[...]                                    # [N, N] bf16 normalized adjacency

    def layer(h_bf16, w_ref, b_ref, relu):
        # bf16 MXU inputs, f32 accumulation; bias add + ReLU stay in f32.
        xw = jnp.dot(h_bf16, w_ref[...], preferred_element_type=jnp.float32)
        agg = jnp.dot(a, xw.astype(jnp.bfloat16), preferred_element_type=jnp.float32)
        agg = agg + b_ref[...]
        return jnp.maximum(agg, 0.0) if relu else agg

    h = layer(x_ref[...], w1_ref, b1_ref, relu=True)                 # conv1 + relu
    h = layer(h.astype(jnp.bfloat16), w2_ref, b2_ref, relu=True)     # conv2 + relu
    h = layer(h.astype(jnp.bfloat16), w21_ref, b21_ref, relu=True)   # conv21 + relu
    out_ref[...] = layer(h.astype(jnp.bfloat16), w3_ref, b3_ref, relu=False)  # conv3


def gcn_net_fused(a_hat_bf16, x_bf16, params, *, vmem_limit=None):
    """params: list of (W_bf16, b_f32[1,F]) per layer; last layer padded to F_LAST_PAD."""
    if vmem_limit is None:
        vmem_limit = vmem_budget_bytes()
    n = a_hat_bf16.shape[0]
    f_out_last = params[-1][0].shape[1]
    args = [a_hat_bf16, x_bf16]
    for w, b in params:
        args += [w, b]
    vmem = pl.BlockSpec(memory_space=pltpu.MemorySpace.VMEM)
    return pl.pallas_call(
        _gcn_net_fused_kernel,
        out_shape=jax.ShapeDtypeStruct((n, f_out_last), jnp.float32),
        in_specs=[vmem] * len(args),
        out_specs=vmem,
        compiler_params=pltpu.CompilerParams(vmem_limit_bytes=vmem_limit),
    )(*args)


# ----------------------- row-tiled aggregation kernel (large N) ----------------------

def _make_agg_kernel(relu):
    def kernel(a_ref, xw_ref, b_ref, out_ref):
        # a_ref: [TM, N] strip of A_hat (streamed); xw_ref: precomputed XW (resident).
        agg = jnp.dot(a_ref[...], xw_ref[...], preferred_element_type=jnp.float32)
        agg = agg + b_ref[...]
        if relu:
            agg = jnp.maximum(agg, 0.0)
        out_ref[...] = agg.astype(out_ref.dtype)
    return kernel


def pick_row_tile(n, *, f_out_max=F_LAST_PAD, out_bytes_max=4, vmem_budget=None):
    """Largest 16-aligned row tile whose double-buffered bf16 A strip + (double-buffered)
    resident XW/bias + double-buffered output strip fits the generation-aware budget,
    while keeping at least 2 grid steps so v7x's second TensorCore stays busy."""
    if vmem_budget is None:
        vmem_budget = vmem_budget_bytes()
    # Pallas double-buffers even constant-index_map operands (XW, bias).
    fixed = 2 * (n * f_out_max * 2) + 2 * (f_out_max * 4)
    tm = 16
    while True:
        cand = tm * 2
        need = fixed + 2 * cand * n * 2 + 2 * cand * f_out_max * out_bytes_max
        if cand > max(n // 2, 16) or need > vmem_budget:
            break
        tm = cand
    return tm


def gcn_agg_tiled(a_hat_bf16, xw_bf16, b_f32, *, relu, tm, out_dtype, vmem_limit):
    """One GCN layer's aggregation: out = maybe_relu(A_hat @ XW + b), row-tiled over A."""
    n = a_hat_bf16.shape[0]
    f_out = xw_bf16.shape[1]
    return pl.pallas_call(
        _make_agg_kernel(relu),
        out_shape=jax.ShapeDtypeStruct((n, f_out), out_dtype),
        grid_spec=pltpu.PrefetchScalarGridSpec(
            num_scalar_prefetch=0,
            grid=(pl.cdiv(n, tm),),
            in_specs=[
                pl.BlockSpec((tm, n), lambda i: (i, 0)),         # A_hat row strip (streamed)
                pl.BlockSpec((n, f_out), lambda i: (0, 0)),      # XW (resident)
                pl.BlockSpec((1, f_out), lambda i: (0, 0)),      # bias
            ],
            out_specs=pl.BlockSpec((tm, f_out), lambda i: (i, 0)),
        ),
        compiler_params=pltpu.CompilerParams(
            dimension_semantics=("parallel",),                   # megacore split on v7x
            vmem_limit_bytes=vmem_limit),
    )(a_hat_bf16, xw_bf16, b_f32)


def gcn_net_tiled(a_hat_bf16, x_bf16, params, *, tm=None, vmem_limit=None):
    """Per-layer row-tiled path. XW = H @ W is hoisted out of the grid (tiny N x 32 x F
    matmul done once per layer in the wrapper); the kernel only streams A_hat strips."""
    if vmem_limit is None:
        vmem_limit = vmem_budget_bytes()
    if tm is None:
        tm = pick_row_tile(a_hat_bf16.shape[0], vmem_budget=vmem_limit)
    h = x_bf16
    out = None
    last = len(params) - 1
    for i, (w, b) in enumerate(params):
        # Hoisted XW: computed once per layer (negligible FLOPs vs. the A @ XW dot).
        xw = jnp.dot(h, w, preferred_element_type=jnp.float32).astype(jnp.bfloat16)
        relu = i < last
        out_dtype = jnp.bfloat16 if relu else jnp.float32
        out = gcn_agg_tiled(a_hat_bf16, xw, b, relu=relu, tm=tm,
                            out_dtype=out_dtype, vmem_limit=vmem_limit)
        h = out                                   # intermediate layers already bf16
    return out


# ------------------------------- dispatch -------------------------------------------

def fused_vmem_estimate(n):
    """Conservative VMEM bytes needed to keep everything resident in the fused kernel."""
    return (n * n * 2                                   # A_hat bf16
            + n * F_HID * 2                             # X bf16
            + 4 * (F_HID * F_LAST_PAD * 2 + F_LAST_PAD * 4)   # weights + biases (overest.)
            + 3 * n * F_LAST_PAD * 4                    # f32 intermediates (overest.)
            + n * F_LAST_PAD * 4)                       # final padded output


def gcn_net(a_hat_bf16, x_bf16, params):
    """A-resident fused path whenever A_hat fits the VMEM budget (avoids re-streaming
    A_hat from HBM once per layer); row-tiled streaming path otherwise."""
    n = a_hat_bf16.shape[0]
    budget = vmem_budget_bytes()
    if fused_vmem_estimate(n) <= budget:
        return gcn_net_fused(a_hat_bf16, x_bf16, params, vmem_limit=budget)
    return gcn_net_tiled(a_hat_bf16, x_bf16, params, vmem_limit=budget)


# ------------------------------- plain-JAX glue -------------------------------------

def ring_edge_index(n):
    """Deterministic undirected ring graph, both edge directions, shape [2, 2n]."""
    edges = []
    for i in range(n):
        j = (i + 1) % n
        edges.append((i, j))
        edges.append((j, i))
    return jnp.array(edges, dtype=jnp.int32).T


def build_norm_adj(edge_index, n):
    """Dense D^-1/2 (A + I) D^-1/2 from a [2, E] edge_index (PyG GCNConv norm)."""
    src = edge_index[0]
    dst = edge_index[1]
    a = jnp.zeros((n, n), jnp.float32).at[dst, src].set(1.0)
    a = a + jnp.eye(n, dtype=jnp.float32)            # add self-loops
    deg = a.sum(axis=1)
    d_inv_sqrt = jnp.where(deg > 0, 1.0 / jnp.sqrt(deg), 0.0)
    return d_inv_sqrt[:, None] * a * d_inv_sqrt[None, :]


def pad_cols(x, width):
    out = jnp.zeros((x.shape[0], width), x.dtype)
    return out.at[:, : x.shape[1]].set(x)


def make_params(keys, dims):
    """Glorot-uniform weights, zero bias. Returns (raw f32 params, kernel bf16 params)."""
    raw, kern = [], []
    last = len(dims) - 1
    for li, ((fi, fo), kk) in enumerate(zip(dims, keys)):
        limit = (6.0 / (fi + fo)) ** 0.5
        w = jax.random.uniform(kk, (fi, fo), jnp.float32, -limit, limit)
        b = jnp.zeros((fo,), jnp.float32)
        raw.append((w, b))
        fi_p = F_HID if li == 0 else fi               # pad 3-wide input features to 32
        fo_p = F_LAST_PAD if li == last else fo       # pad final 1-wide output to 128
        w_k = jnp.zeros((fi_p, fo_p), jnp.float32).at[:fi, :fo].set(w)
        b_k = jnp.zeros((1, fo_p), jnp.float32).at[0, :fo].set(b)
        kern.append((w_k.astype(jnp.bfloat16), b_k))  # weights bf16, bias stays f32
    return raw, kern


def jax_reference(a_hat, x, raw_params, matmul_dtype=jnp.float32):
    """Pure-JAX reference; matmul_dtype=bf16 mirrors the kernel's mixed precision."""
    a = a_hat.astype(matmul_dtype)
    h = x
    n_layers = len(raw_params)
    for i, (w, b) in enumerate(raw_params):
        xw = jnp.dot(h.astype(matmul_dtype), w.astype(matmul_dtype),
                     preferred_element_type=jnp.float32)
        h = jnp.dot(a, xw.astype(matmul_dtype),
                    preferred_element_type=jnp.float32) + b[None, :]
        if i < n_layers - 1:
            h = jnp.maximum(h, 0.0)
    return h


if __name__ == "__main__":
    key = jax.random.PRNGKey(0)
    k_x, k1, k2, k21, k3, k_x2 = jax.random.split(key, 6)

    dims = [(3, 32), (32, 32), (32, 32), (32, 1)]
    raw_params, kernel_params = make_params([k1, k2, k21, k3], dims)

    # --- small graph (N=16): dispatcher picks the fused, A-resident kernel ------------
    N = 16
    edge_index = ring_edge_index(N)                    # [2, 32]
    a_hat = build_norm_adj(edge_index, N)              # [N, N] f32
    x = jax.random.normal(k_x, (N, 3), jnp.float32)    # data.x (3 input features)

    out = gcn_net(a_hat.astype(jnp.bfloat16),
                  pad_cols(x, F_HID).astype(jnp.bfloat16),
                  kernel_params)[:, :1]                # [N, 1], matches PyTorch output
    jax.block_until_ready(out)

    ref_bf16 = jax_reference(a_hat, x, raw_params, matmul_dtype=jnp.bfloat16)
    ref_f32 = jax_reference(a_hat, x, raw_params, matmul_dtype=jnp.float32)
    assert jnp.allclose(out, ref_bf16, atol=2e-3, rtol=2e-3), "fused: mismatch vs bf16 ref"
    assert jnp.allclose(out, ref_f32, atol=5e-2, rtol=5e-2), "fused: mismatch vs f32 ref"

    # --- larger graph (N=64): force the row-tiled streaming path (scalable structure) -
    N2 = 64
    edge_index2 = ring_edge_index(N2)
    a_hat2 = build_norm_adj(edge_index2, N2)
    x2 = jax.random.normal(k_x2, (N2, 3), jnp.float32)
    tm = 16                                            # small tile to exercise the grid
    out2 = gcn_net_tiled(a_hat2.astype(jnp.bfloat16),
                         pad_cols(x2, F_HID).astype(jnp.bfloat16),
                         kernel_params, tm=tm)[:, :1]
    jax.block_until_ready(out2)

    ref2_bf16 = jax_reference(a_hat2, x2, raw_params, matmul_dtype=jnp.bfloat16)
    ref2_f32 = jax_reference(a_hat2, x2, raw_params, matmul_dtype=jnp.float32)
    assert jnp.allclose(out2, ref2_bf16, atol=2e-3, rtol=2e-3), "tiled: mismatch vs bf16 ref"
    assert jnp.allclose(out2, ref2_f32, atol=5e-2, rtol=5e-2), "tiled: mismatch vs f32 ref"

    print("KERNEL_OK")
</pallas_src>

<mosaic_0001>
module attributes {stable_mosaic.version = 11 : i64} {
  func.func @_gcn_net_fused_kernel(%arg0: memref<16x16xbf16, #tpu.memory_space<vmem>>, %arg1: memref<16x32xbf16, #tpu.memory_space<vmem>>, %arg2: memref<32x32xbf16, #tpu.memory_space<vmem>>, %arg3: memref<1x32xf32, #tpu.memory_space<vmem>>, %arg4: memref<32x32xbf16, #tpu.memory_space<vmem>>, %arg5: memref<1x32xf32, #tpu.memory_space<vmem>>, %arg6: memref<32x32xbf16, #tpu.memory_space<vmem>>, %arg7: memref<1x32xf32, #tpu.memory_space<vmem>>, %arg8: memref<32x128xbf16, #tpu.memory_space<vmem>>, %arg9: memref<1x128xf32, #tpu.memory_space<vmem>>, %arg10: memref<16x128xf32, #tpu.memory_space<vmem>>) attributes {dimension_semantics = [], scalar_prefetch = 0 : i64, scratch_operands = 0 : i64, tpu.core_type = #tpu.core_type<tc>} {
    %c0 = arith.constant 0 : index
    %c0_0 = arith.constant 0 : index
    %0 = vector.load %arg0[%c0, %c0_0] : memref<16x16xbf16, #tpu.memory_space<vmem>>, vector<16x16xbf16>
    %c0_1 = arith.constant 0 : index
    %c0_2 = arith.constant 0 : index
    %1 = vector.load %arg1[%c0_1, %c0_2] : memref<16x32xbf16, #tpu.memory_space<vmem>>, vector<16x32xbf16>
    %c0_3 = arith.constant 0 : index
    %c0_4 = arith.constant 0 : index
    %2 = vector.load %arg2[%c0_3, %c0_4] : memref<32x32xbf16, #tpu.memory_space<vmem>>, vector<32x32xbf16>
    %cst = arith.constant dense<0.000000e+00> : vector<16x32xf32>
    %3 = tpu.matmul %1, %2, %cst {dimension_numbers = #tpu.dot_dimension_numbers<[1], [0], [0], [1], [0, 0, 1, 1], [], []>} : vector<16x32xbf16>, vector<32x32xbf16>, vector<16x32xf32> -> vector<16x32xf32>
    %4 = arith.truncf %3 : vector<16x32xf32> to vector<16x32xbf16>
    %cst_5 = arith.constant dense<0.000000e+00> : vector<16x32xf32>
    %5 = tpu.matmul %0, %4, %cst_5 {dimension_numbers = #tpu.dot_dimension_numbers<[1], [0], [0], [1], [0, 0, 1, 1], [], []>} : vector<16x16xbf16>, vector<16x32xbf16>, vector<16x32xf32> -> vector<16x32xf32>
    %c0_6 = arith.constant 0 : index
    %c0_7 = arith.constant 0 : index
    %6 = vector.load %arg3[%c0_6, %c0_7] : memref<1x32xf32, #tpu.memory_space<vmem>>, vector<1x32xf32>
    %7 = vector.broadcast %6 : vector<1x32xf32> to vector<16x32xf32>
    %8 = arith.addf %5, %7 : vector<16x32xf32>
    %cst_8 = arith.constant 0.000000e+00 : f32
    %9 = vector.broadcast %cst_8 : f32 to vector<16x32xf32>
    %10 = arith.maximumf %8, %9 : vector<16x32xf32>
    %11 = arith.truncf %10 : vector<16x32xf32> to vector<16x32xbf16>
    %c0_9 = arith.constant 0 : index
    %c0_10 = arith.constant 0 : index
    %12 = vector.load %arg4[%c0_9, %c0_10] : memref<32x32xbf16, #tpu.memory_space<vmem>>, vector<32x32xbf16>
    %cst_11 = arith.constant dense<0.000000e+00> : vector<16x32xf32>
    %13 = tpu.matmul %11, %12, %cst_11 {dimension_numbers = #tpu.dot_dimension_numbers<[1], [0], [0], [1], [0, 0, 1, 1], [], []>} : vector<16x32xbf16>, vector<32x32xbf16>, vector<16x32xf32> -> vector<16x32xf32>
    %14 = arith.truncf %13 : vector<16x32xf32> to vector<16x32xbf16>
    %cst_12 = arith.constant dense<0.000000e+00> : vector<16x32xf32>
    %15 = tpu.matmul %0, %14, %cst_12 {dimension_numbers = #tpu.dot_dimension_numbers<[1], [0], [0], [1], [0, 0, 1, 1], [], []>} : vector<16x16xbf16>, vector<16x32xbf16>, vector<16x32xf32> -> vector<16x32xf32>
    %c0_13 = arith.constant 0 : index
    %c0_14 = arith.constant 0 : index
    %16 = vector.load %arg5[%c0_13, %c0_14] : memref<1x32xf32, #tpu.memory_space<vmem>>, vector<1x32xf32>
    %17 = vector.broadcast %16 : vector<1x32xf32> to vector<16x32xf32>
    %18 = arith.addf %15, %17 : vector<16x32xf32>
    %cst_15 = arith.constant 0.000000e+00 : f32
    %19 = vector.broadcast %cst_15 : f32 to vector<16x32xf32>
    %20 = arith.maximumf %18, %19 : vector<16x32xf32>
    %21 = arith.truncf %20 : vector<16x32xf32> to vector<16x32xbf16>
    %c0_16 = arith.constant 0 : index
    %c0_17 = arith.constant 0 : index
    %22 = vector.load %arg6[%c0_16, %c0_17] : memref<32x32xbf16, #tpu.memory_space<vmem>>, vector<32x32xbf16>
    %cst_18 = arith.constant dense<0.000000e+00> : vector<16x32xf32>
    %23 = tpu.matmul %21, %22, %cst_18 {dimension_numbers = #tpu.dot_dimension_numbers<[1], [0], [0], [1], [0, 0, 1, 1], [], []>} : vector<16x32xbf16>, vector<32x32xbf16>, vector<16x32xf32> -> vector<16x32xf32>
    %24 = arith.truncf %23 : vector<16x32xf32> to vector<16x32xbf16>
    %cst_19 = arith.constant dense<0.000000e+00> : vector<16x32xf32>
    %25 = tpu.matmul %0, %24, %cst_19 {dimension_numbers = #tpu.dot_dimension_numbers<[1], [0], [0], [1], [0, 0, 1, 1], [], []>} : vector<16x16xbf16>, vector<16x32xbf16>, vector<16x32xf32> -> vector<16x32xf32>
    %c0_20 = arith.constant 0 : index
    %c0_21 = arith.constant 0 : index
    %26 = vector.load %arg7[%c0_20, %c0_21] : memref<1x32xf32, #tpu.memory_space<vmem>>, vector<1x32xf32>
    %27 = vector.broadcast %26 : vector<1x32xf32> to vector<16x32xf32>
    %28 = arith.addf %25, %27 : vector<16x32xf32>
    %cst_22 = arith.constant 0.000000e+00 : f32
    %29 = vector.broadcast %cst_22 : f32 to vector<16x32xf32>
    %30 = arith.maximumf %28, %29 : vector<16x32xf32>
    %31 = arith.truncf %30 : vector<16x32xf32> to vector<16x32xbf16>
    %c0_23 = arith.constant 0 : index
    %c0_24 = arith.constant 0 : index
    %32 = vector.load %arg8[%c0_23, %c0_24] : memref<32x128xbf16, #tpu.memory_space<vmem>>, vector<32x128xbf16>
    %cst_25 = arith.constant dense<0.000000e+00> : vector<16x128xf32>
    %33 = tpu.matmul %31, %32, %cst_25 {dimension_numbers = #tpu.dot_dimension_numbers<[1], [0], [0], [1], [0, 0, 1, 1], [], []>} : vector<16x32xbf16>, vector<32x128xbf16>, vector<16x128xf32> -> vector<16x128xf32>
    %34 = arith.truncf %33 : vector<16x128xf32> to vector<16x128xbf16>
    %cst_26 = arith.constant dense<0.000000e+00> : vector<16x128xf32>
    %35 = tpu.matmul %0, %34, %cst_26 {dimension_numbers = #tpu.dot_dimension_numbers<[1], [0], [0], [1], [0, 0, 1, 1], [], []>} : vector<16x16xbf16>, vector<16x128xbf16>, vector<16x128xf32> -> vector<16x128xf32>
    %c0_27 = arith.constant 0 : index
    %c0_28 = arith.constant 0 : index
    %36 = vector.load %arg9[%c0_27, %c0_28] : memref<1x128xf32, #tpu.memory_space<vmem>>, vector<1x128xf32>
    %37 = vector.broadcast %36 : vector<1x128xf32> to vector<16x128xf32>
    %38 = arith.addf %35, %37 : vector<16x128xf32>
    %c0_29 = arith.constant 0 : index
    %c0_30 = arith.constant 0 : index
    %39 = vector.load %arg10[%c0_29, %c0_30] : memref<16x128xf32, #tpu.memory_space<vmem>>, vector<16x128xf32>
    tpu.vector_store %arg10[%c0_29, %c0_30], %38 {strides = array<i32>} : memref<16x128xf32, #tpu.memory_space<vmem>>, vector<16x128xf32>,
    return
  }
}

</mosaic_0001>

<bundles_post_ra>
// kernel: tpu_custom_call.1
= control target key start
LH: loop header
LB: loop body
LE: loop exit
PB: predicated region body
PF: predicated region fallthrough
CT: control target
= control target key end

     0   :  { %15 = vsyncpa [#allocation3], 0  ;;  %s1078_s0 = inlined_call_operand.hbm [shape: bf16[16,16], index: 0, kind: input, shape index: {}]   ;;  %s1079_s1 = inlined_call_operand.hbm [shape: bf16[16,32], index: 1, kind: input, shape index: {}]   ;;  %s1080_s2 = inlined_call_operand.hbm [shape: bf16[32,32], index: 2, kind: input, shape index: {}]   ;;  %s1081_s3 = inlined_call_operand.vmem [shape: f32[1,32], index: 3, kind: input, shape index: {}]   ;;  %s1082_s4 = inlined_call_operand.hbm [shape: bf16[32,32], index: 4, kind: input, shape index: {}]   ;;  %s1083_s5 = inlined_call_operand.vmem [shape: f32[1,32], index: 5, kind: input, shape index: {}]   ;;  %s1084_s6 = inlined_call_operand.vmem [shape: bf16[32,32], index: 6, kind: input, shape index: {}]   ;;  %s1085_s7 = inlined_call_operand.vmem [shape: f32[1,32], index: 7, kind: input, shape index: {}]   ;;  %s1086_s8 = inlined_call_operand.hbm [shape: bf16[32,128], index: 8, kind: input, shape index: {}]   ;;  %s1087_s9 = inlined_call_operand.vmem [shape: f32[1,128], index: 9, kind: input, shape index: {}]   ;;  %s1088_s10 = inlined_call_operand.hbm [shape: f32[16,128], index: 10, kind: output, shape index: {}]  }
   0x1   :  { %16 = vsyncpa [#allocation6], 0 }
   0x2   :  { %17 = vsyncpa [#allocation9], 0 }
   0x3   :  { %18 = vsyncpa [#allocation4], 0  ;;  %s850_s13 = smov [#allocation5]   ;;  %s851_s15 = smov [#allocation8]  }
   0x4   :  { %s36_s14 = sshll.u32 %s850_s13, 4  ;;  %s62_s16 = sshll.u32 %s851_s15, 4  ;;  %s37_s14 = int_to_ptr.vmem [resolvable:$true] %s36_s14  ;;  %s917_s16 = int_to_ptr.vmem [resolvable:$true] %s62_s16 }
   0x5   :  { %s710_s19 = scalar_lea.hbm %s1079_s1, 128 }
   0x6   :  { %p711_p0 = scmp.ne.s32.totalorder %s1079_s1, %s710_s19  ;;  %p714_p1 = scmp.lt.u32.totalorder %s710_s19, %s1079_s1 }
   0x8   :  { %p716_p2 = pnand %p714_p1, %p711_p0 }
   0xa   :  { %719 = shalt.err (!%p716_p2)
}
   0xb   :  { %s720_s24 = scalar_lea.vmem %s37_s14, 128  ;;  %p725_p4 = scmp.lt.s32.totalorder %s37_s14, %s37_s14 }
   0xc   :  { %p721_p3 = scmp.ne.s32.totalorder %s37_s14, %s720_s24  ;;  %p726_p5 = scmp.lt.s32.totalorder %s720_s24, %s720_s24 }
   0xe   :  { %p727_p6 = por %p726_p5, %p725_p4 }
  0x10   :  { %p728_p7 = pnand %p727_p6, %p721_p3 }
  0x12   :  { %731 = shalt.err (!%p728_p7)
}
  0x13   :  { %s852_s25 = smov 64   ;;  %s853_s26 = smov 4  }
  0x14   :  { %42 = dma.hbm_to_vmem [thread:$0]  %s1079_s1, 128, %s37_s14, [#allocation6], %s852_s25, %s852_s25, %s853_s26  }
  0x15   :  { %s732_s11 = scalar_lea.hbm %s1082_s4, 256 }
  0x16   :  { %p733_p8 = scmp.ne.s32.totalorder %s1082_s4, %s732_s11  ;;  %p736_p9 = scmp.lt.u32.totalorder %s732_s11, %s1082_s4 }
  0x18   :  { %p738_p10 = pnand %p736_p9, %p733_p8 }
  0x1a   :  { %741 = shalt.err (!%p738_p10)
}
  0x1b   :  { %s742_s18 = scalar_lea.vmem %s917_s16, 256  ;;  %p747_p12 = scmp.lt.s32.totalorder %s917_s16, %s917_s16 }
  0x1c   :  { %p743_p11 = scmp.ne.s32.totalorder %s917_s16, %s742_s18  ;;  %p748_p13 = scmp.lt.s32.totalorder %s742_s18, %s742_s18 }
  0x1e   :  { %p749_p0 = por %p748_p13, %p747_p12 }
  0x20   :  { %p750_p1 = pnand %p749_p0, %p743_p11 }
  0x22   :  { %753 = shalt.err (!%p750_p1)
}
  0x23   :  { %68 = dma.hbm_to_vmem [thread:$0]  %s1082_s4, 256, %s917_s16, [#allocation9], %s852_s25, %s852_s25, %s853_s26  }
  0x24   :  { %s854_s19 = smov [#allocation2]   ;;  %s855_s21 = smov [#allocation7]  }
  0x25   :  { %s24_s20 = sshll.u32 %s854_s19, 4  ;;  %s48_s22 = sshll.u32 %s855_s21, 4  ;;  %s25_s20 = int_to_ptr.vmem [resolvable:$true] %s24_s20  ;;  %s954_s22 = int_to_ptr.vmem [resolvable:$true] %s48_s22 }
  0x26   :  { %s754_s27 = scalar_lea.hbm %s1078_s0, 128 }
  0x27   :  { %p755_p2 = scmp.ne.s32.totalorder %s1078_s0, %s754_s27  ;;  %p758_p3 = scmp.lt.u32.totalorder %s754_s27, %s1078_s0 }
  0x29   :  { %p760_p4 = pnand %p758_p3, %p755_p2 }
  0x2b   :  { %763 = shalt.err (!%p760_p4)
}
  0x2c   :  { %s764_s4 = scalar_lea.vmem %s25_s20, 128  ;;  %p769_p6 = scmp.lt.s32.totalorder %s25_s20, %s25_s20 }
  0x2d   :  { %p765_p5 = scmp.ne.s32.totalorder %s25_s20, %s764_s4  ;;  %p770_p7 = scmp.lt.s32.totalorder %s764_s4, %s764_s4 }
  0x2f   :  { %p771_p8 = por %p770_p7, %p769_p6 }
  0x31   :  { %p772_p9 = pnand %p771_p8, %p765_p5 }
  0x33   :  { %775 = shalt.err (!%p772_p9)
}
  0x34   :  { %30 = dma.hbm_to_vmem [thread:$0]  %s1078_s0, 128, %s25_s20, [#allocation3], %s852_s25, %s852_s25, %s853_s26  }
  0x35   :  { %s776_s17 = scalar_lea.hbm %s1080_s2, 256 }
  0x36   :  { %p777_p10 = scmp.ne.s32.totalorder %s1080_s2, %s776_s17  ;;  %p780_p11 = scmp.lt.u32.totalorder %s776_s17, %s1080_s2 }
  0x38   :  { %p782_p12 = pnand %p780_p11, %p777_p10 }
  0x3a   :  { %785 = shalt.err (!%p782_p12)
}
  0x3b   :  { %s786_s21 = scalar_lea.vmem %s954_s22, 256  ;;  %p791_p0 = scmp.lt.s32.totalorder %s954_s22, %s954_s22 }
  0x3c   :  { %p787_p13 = scmp.ne.s32.totalorder %s954_s22, %s786_s21  ;;  %p792_p1 = scmp.lt.s32.totalorder %s786_s21, %s786_s21 }
  0x3e   :  { %p793_p2 = por %p792_p1, %p791_p0 }
  0x40   :  { %p794_p3 = pnand %p793_p2, %p787_p13 }
  0x42   :  { %797 = shalt.err (!%p794_p3)
}
  0x43   :  { %54 = dma.hbm_to_vmem [thread:$0]  %s1080_s2, 256, %s954_s22, [#allocation6], %s852_s25, %s852_s25, %s853_s26  }
  0x44   :  { %s856_s23 = smov [#allocation10]   ;;  %s798_s29 = scalar_lea.hbm %s1086_s8, 256 }
  0x45   :  { %s80_s24 = sshll.u32 %s856_s23, 4  ;;  %p799_p4 = scmp.ne.s32.totalorder %s1086_s8, %s798_s29  ;;  %s81_s24 = int_to_ptr.vmem [resolvable:$true] %s80_s24 }
  0x46   :  { %p802_p5 = scmp.lt.u32.totalorder %s798_s29, %s1086_s8 }
  0x48   :  { %p804_p6 = pnand %p802_p5, %p799_p4 }
  0x4a   :  { %807 = shalt.err (!%p804_p6)
}
  0x4b   :  { %s808_s12 = scalar_lea.vmem %s81_s24, 256  ;;  %p813_p8 = scmp.lt.s32.totalorder %s81_s24, %s81_s24 }
  0x4c   :  { %p809_p7 = scmp.ne.s32.totalorder %s81_s24, %s808_s12  ;;  %p814_p9 = scmp.lt.s32.totalorder %s808_s12, %s808_s12 }
  0x4e   :  { %p815_p10 = por %p814_p9, %p813_p8 }
  0x50   :  { %p816_p11 = pnand %p815_p10, %p809_p7 }
  0x52   :  { %819 = shalt.err (!%p816_p11)
}
  0x53   :  { %86 = dma.hbm_to_vmem [thread:$0]  %s1086_s8, 256, %s81_s24, [#allocation9], %s852_s25, %s852_s25, %s853_s26  }
  0x54   :  { %842 = dma.done.wait [#allocation3], 128  }
  0x55   :  { %843 = vsyncadd [#allocation3], 4294967168 }
  0x56   :  { %844 = dma.done.wait [#allocation6], 384  }
  0x57   :  { %845 = vsyncadd [#allocation6], 4294966912 }
  0x58   :  { %846 = dma.done.wait [#allocation9], 512  }
  0x59   :  { %847 = vsyncadd [#allocation9], 4294966784  ;;  %v857_v0 = vmov 0.0   ;;  %vm858_vm0 = vmmov 0   ;;  %v700_v1 = vld [vmem:[#allocation7] sm:$0xff]   ;;  %v701_v2 = vld [vmem:[#allocation7 + $0x8] sm:$0xff]  }
  0x5a   :  { %632 = vmatprep.subr.bf16.mxu0 %v857_v0  ;;  %636 = vmatprep.mubr.msk.bf16.mxu0 %vm858_vm0, %v857_v0  ;;  %vm130_vm1 = vcmask 261120   ;;  %v702_v3 = vld [vmem:[#allocation5] sm:$0xff]   ;;  %v1017_v9 = vld [vmem:[#allocation2] sm:$0xff]   ;;  %vm188_vm2 = vcmask 130048   ;;  %v594_v12 = vld [vmem:[%s1081_s3] ss:$0 sm:$0xff] }
  0x5b   :  { %640 = vmatprep.subr.bf16.mxu1 %v857_v0  ;;  %642 = vmatprep.mubr.msk.bf16.mxu1 %vm858_vm0, %v857_v0  ;;  %v704_v10 = vld [vmem:[#allocation8] sm:$0xff]   ;;  %v705_v11 = vld [vmem:[#allocation8 + $0x8] sm:$0xff]   ;;  %v706_v27 = vld [vmem:[%s1084_s6] sm:$0xff]   ;;  %s859_s14 = smov [#allocation11]  }
  0x5c   :  { %633 = vmatpush3.bf16.msra.mxu0 %v700_v1  ;;  %v707_v28 = vld [vmem:[%s1084_s6 + $0x8] sm:$0xff]   ;;  %v600_v29 = vld [vmem:[%s1083_s5] ss:$0 sm:$0xff]  ;;  %s576_s19 = sshll.u32 %s859_s14, 4  ;;  %s577_s19 = int_to_ptr.vmem [resolvable:$true] %s576_s19 }
  0x5d   :  { %634 = vmatprep.subr.bf16.mxu0 %v857_v0  ;;  %v708_v44 = vld [vmem:[#allocation10] sm:$0xff]   ;;  %v709_v45 = vld [vmem:[#allocation10 + $0x8] sm:$0xff]   ;;  %s820_s21 = scalar_lea.vmem %s577_s19, 256  ;;  %p825_p13 = scmp.lt.s32.totalorder %s577_s19, %s577_s19 }
  0x5e   :  { %v605_v46 = vld [vmem:[%s1085_s7] ss:$0 sm:$0xff]  ;;  %p821_p12 = scmp.ne.s32.totalorder %s577_s19, %s820_s21  ;;  %p826_p0 = scmp.lt.s32.totalorder %s820_s21, %s820_s21 }
  0x5f   :  { %v610_v61 = vld [vmem:[%s1087_s9] ss:$0 sm:$0xff] }
  0x60   :  { %635 = vmatpush3.bf16.msra.mxu0 %v701_v2  ;;  %p827_p1 = por %p826_p0, %p825_p13 }
  0x61   :  { %654 = vmatprep.subr.bf16.mxu0 %v857_v0 }
  0x62   :  { %p828_p2 = pnand %p827_p1, %p821_p12 }
  0x63   :  { %637 = vmatmul.mubr.msk.bf16.vlgmr.msra.gmra.mrb[0].mxu0 %vm130_vm1, %v702_v3 }
  0x64   :  { %656 = vmatprep.mubr.msk.bf16.mxu0 %vm858_vm0, %v857_v0 }
 0x136   :  { %v168_v4 = vpop.f32.mrb[0].mxu0 }
 0x137   :  { %v638_v5 = vpop.f32.mrb[1].mxu0 }
 0x138   :  { %v171_v6 = vpop.f32.mrb[2].mxu0 }
 0x139   :  { %v175_v7 = vpack.c.bf16 %v171_v6, %v168_v4  ;;  %v639_v8 = vpop.f32.mrb[3].mxu0 }
 0x13b   :  { %641 = vmatpush3.bf16.msra.mxu1 %v175_v7 }
 0x13c   :  { %646 = vmatprep.subr.bf16.mxu1 %v857_v0 }
 0x13e   :  { %643 = vmatmul.mubr.msk.bf16.vlgmr.msra.gmra.mrb[0].mxu1 %vm188_vm2, %v1017_v9 }
 0x13f   :  { %650 = vmatprep.mubr.msk.bf16.mxu1 %vm858_vm0, %v857_v0  ;;  %647 = vmatpush3.bf16.msra.mxu1 %v704_v10 }
 0x140   :  { %648 = vmatprep.subr.bf16.mxu1 %v857_v0 }
 0x143   :  { %649 = vmatpush3.bf16.msra.mxu1 %v705_v11 }
 0x144   :  { %660 = vmatprep.subr.bf16.mxu1 %v857_v0 }
 0x211   :  { %v226_v13 = vpop.f32.mrb[0].mxu1 }
 0x212   :  { %v227_v14 = vadd.f32 %v594_v12, %v226_v13  ;;  %v644_v15 = vpop.f32.mrb[1].mxu1 }
 0x213   :  { %v229_v16 = vpop.f32.mrb[2].mxu1 }
 0x214   :  { %v230_v17 = vadd.f32 %v594_v12, %v229_v16  ;;  %v645_v18 = vpop.f32.mrb[3].mxu1  ;;  %v233_v19 = vmax.f32 %v227_v14, 0.0 }
 0x216   :  { %v234_v20 = vmax.f32 %v230_v17, 0.0 }
 0x218   :  { %v235_v21 = vpack.c.bf16 %v234_v20, %v233_v19 }
 0x21a   :  { %651 = vmatmul.mubr.msk.bf16.vlgmr.msra.gmra.mrb[4].mxu1 %vm130_vm1, %v235_v21 }
 0x21b   :  { %664 = vmatprep.mubr.msk.bf16.mxu1 %vm858_vm0, %v857_v0  ;;  %661 = vmatpush3.bf16.msra.mxu1 %v706_v27 }
 0x21c   :  { %662 = vmatprep.subr.bf16.mxu1 %v857_v0 }
 0x21f   :  { %663 = vmatpush3.bf16.msra.mxu1 %v707_v28 }
 0x220   :  { %674 = vmatprep.subr.bf16.mxu1 %v857_v0 }
 0x2ed   :  { %v289_v22 = vpop.f32.mrb[4].mxu1 }
 0x2ee   :  { %v652_v23 = vpop.f32.mrb[5].mxu1 }
 0x2ef   :  { %v292_v24 = vpop.f32.mrb[6].mxu1 }
 0x2f0   :  { %v296_v25 = vpack.c.bf16 %v292_v24, %v289_v22  ;;  %v653_v26 = vpop.f32.mrb[7].mxu1 }
 0x2f2   :  { %655 = vmatpush3.bf16.msra.mxu0 %v296_v25 }
 0x2f3   :  { %668 = vmatprep.subr.bf16.mxu0 %v857_v0 }
 0x2f5   :  { %657 = vmatmul.mubr.msk.bf16.vlgmr.msra.gmra.mrb[4].mxu0 %vm188_vm2, %v1017_v9 }
 0x2f6   :  { %670 = vmatprep.mubr.msk.bf16.mxu0 %vm858_vm0, %v857_v0 }
 0x3c8   :  { %v338_v30 = vpop.f32.mrb[4].mxu0 }
 0x3c9   :  { %v339_v31 = vadd.f32 %v600_v29, %v338_v30  ;;  %v658_v32 = vpop.f32.mrb[5].mxu0 }
 0x3ca   :  { %v341_v33 = vpop.f32.mrb[6].mxu0 }
 0x3cb   :  { %v342_v34 = vadd.f32 %v600_v29, %v341_v33  ;;  %v659_v35 = vpop.f32.mrb[7].mxu0  ;;  %v345_v36 = vmax.f32 %v339_v31, 0.0 }
 0x3cd   :  { %v346_v37 = vmax.f32 %v342_v34, 0.0 }
 0x3cf   :  { %v347_v38 = vpack.c.bf16 %v346_v37, %v345_v36 }
 0x3d1   :  { %665 = vmatmul.mubr.msk.bf16.vlgmr.msra.gmra.mrb[8].mxu1 %vm130_vm1, %v347_v38 }
 0x3d2   :  { %678 = vmatprep.mubr.msk.bf16.mxu1 %vm858_vm0, %v857_v0  ;;  %675 = vmatpush3.bf16.msra.mxu1 %v708_v44 }
 0x3d3   :  { %676 = vmatprep.subr.bf16.mxu1 %v857_v0 }
 0x3d6   :  { %677 = vmatpush3.bf16.msra.mxu1 %v709_v45 }
 0x4a4   :  { %v401_v39 = vpop.f32.mrb[8].mxu1 }
 0x4a5   :  { %v666_v40 = vpop.f32.mrb[9].mxu1 }
 0x4a6   :  { %v404_v41 = vpop.f32.mrb[10].mxu1 }
 0x4a7   :  { %v408_v42 = vpack.c.bf16 %v404_v41, %v401_v39  ;;  %v667_v43 = vpop.f32.mrb[11].mxu1 }
 0x4a9   :  { %669 = vmatpush3.bf16.msra.mxu0 %v408_v42 }
 0x4aa   :  { %682 = vmatprep.subr.bf16.mxu0 %v857_v0 }
 0x4ac   :  { %671 = vmatmul.mubr.msk.bf16.vlgmr.msra.gmra.mrb[8].mxu0 %vm188_vm2, %v1017_v9 }
 0x4ad   :  { %684 = vmatprep.mubr.msk.bf16.mxu0 %vm858_vm0, %v857_v0 }
 0x57f   :  { %v450_v47 = vpop.f32.mrb[8].mxu0 }
 0x580   :  { %v451_v48 = vadd.f32 %v605_v46, %v450_v47  ;;  %v672_v49 = vpop.f32.mrb[9].mxu0 }
 0x581   :  { %v453_v50 = vpop.f32.mrb[10].mxu0 }
 0x582   :  { %v454_v51 = vadd.f32 %v605_v46, %v453_v50  ;;  %v673_v52 = vpop.f32.mrb[11].mxu0  ;;  %v457_v53 = vmax.f32 %v451_v48, 0.0 }
 0x584   :  { %v458_v54 = vmax.f32 %v454_v51, 0.0 }
 0x586   :  { %v459_v55 = vpack.c.bf16 %v458_v54, %v457_v53 }
 0x588   :  { %679 = vmatmul.mubr.msk.bf16.vlgmr.msra.gmra.mrb[12].mxu1 %vm130_vm1, %v459_v55 }
 0x65b   :  { %v513_v56 = vpop.f32.mrb[12].mxu1 }
 0x65c   :  { %v680_v57 = vpop.f32.mrb[13].mxu1 }
 0x65d   :  { %v516_v58 = vpop.f32.mrb[14].mxu1 }
 0x65e   :  { %v520_v59 = vpack.c.bf16 %v516_v58, %v513_v56  ;;  %v681_v60 = vpop.f32.mrb[15].mxu1 }
 0x660   :  { %683 = vmatpush3.bf16.msra.mxu0 %v520_v59 }
 0x663   :  { %685 = vmatmul.mubr.msk.bf16.vlgmr.msra.gmra.mrb[12].mxu0 %vm188_vm2, %v1017_v9 }
 0x736   :  { %v562_v62 = vpop.f32.mrb[12].mxu0 }
 0x737   :  { %v563_v63 = vadd.f32 %v610_v61, %v562_v62  ;;  %v686_v0 = vpop.f32.mrb[13].mxu0 }
 0x738   :  { %v565_v1 = vpop.f32.mrb[14].mxu0 }
 0x739   :  { %569 = vst [vmem:[#allocation11] sm:$0xff] %v563_v63  ;;  %v566_v2 = vadd.f32 %v610_v61, %v565_v1  ;;  %v687_v3 = vpop.f32.mrb[15].mxu0 }
 0x73b   :  { %570 = vst [vmem:[#allocation11 + $0x8] sm:$0xff] %v566_v2 }
 0x73c   :  { %831 = shalt.err (!%p828_p2)
}
 0x73d   :  { %s832_s20 = scalar_lea.hbm %s1088_s10, 256 }
 0x73e   :  { %p833_p3 = scmp.ne.s32.totalorder %s1088_s10, %s832_s20  ;;  %p836_p4 = scmp.lt.u32.totalorder %s832_s20, %s1088_s10 }
 0x740   :  { %p838_p5 = pnand %p836_p4, %p833_p3 }
 0x742   :  { %841 = shalt.err (!%p838_p5)
}
 0x743   :  { %s860_s29 = smov 128   ;;  %s861_s30 = smov 8  }
 0x744   :  { %582 = dma.vmem_to_hbm [thread:$0]  %s577_s19, 256, %s1088_s10, [#allocation4], %s860_s29, %s860_s29, %s861_s30  }
 0x745   :  { %848 = dma.done.wait [#allocation4], 256  }
 0x746   :  { %849 = vsyncadd [#allocation4], 4294967040 }
 0x747   :  { %586 = vsyncpa [#allocation3], 1 }
 0x748   :  { %587 = vsyncpa [#allocation6], 1 }
 0x749   :  { %588 = vsyncpa [#allocation9], 1 }
 0x74a   :  { %589 = vsyncpa [#allocation4], 1 }

</bundles_post_ra>
